<compile_context>
chip_gen: v6e
topology: v6e:2x2x1
jax: 0.10.0
libtpu: 0.0.40
codegen_flags: <defaults>
</compile_context>

<pallas_src>
import numpy as np
import jax
import jax.numpy as jnp
from jax.experimental import pallas as pl
from jax.experimental.pallas import tpu as pltpu


# ---------------------------------------------------------------------------
# Pallas kernel: full PPM (all bins) for one batch element.
# ---------------------------------------------------------------------------
def ppm_fused_kernel(x_ref, pt_ref, w_ref, bias_ref, mask_ref, ut_ref, out_ref):
    C = x_ref.shape[0]
    x = x_ref[...]                                                        # (C, HW)

    # Adaptive average pooling for every bin in one matmul (contracts HW first,
    # so the 1x1 conv below only ever sees B2 = sum(b^2) columns, not HW).
    pooled = jnp.dot(x, pt_ref[...], preferred_element_type=jnp.float32)  # (C, B2)

    # 1x1 conv for all branches at once (eval-mode BN scale folded into W_cat).
    z = jnp.dot(w_ref[...], pooled, preferred_element_type=jnp.float32)   # (RB, B2)

    # BN bias + ReLU; the 0/1 block mask kills cross-branch (row-block,
    # col-block) terms so only each branch's own pooled bins survive.
    y = jnp.maximum(z + bias_ref[...], 0.0) * mask_ref[...]               # (RB, B2)

    # Bilinear upsample (align_corners=True) for all branches in one matmul.
    up = jnp.dot(y, ut_ref[...], preferred_element_type=jnp.float32)      # (RB, HW)

    # Write the concatenated [x, branches] channel layout directly.
    out_ref[:C, :] = x.astype(out_ref.dtype)
    out_ref[C:, :] = up.astype(out_ref.dtype)


def ppm_forward(x, fused):
    """x: (N, C, H, W) NCHW. Returns (N, C + num_bins*red_dim, H, W)."""
    N, C, H, W = x.shape
    HW = H * W
    x_flat = x.reshape(N, C, HW)
    RB, _ = fused["W_cat"].shape          # RB = num_bins * red_dim
    B2 = fused["P_T_cat"].shape[1]        # sum of bin*bin over all bins
    C_out = C + RB

    out = pl.pallas_call(
        ppm_fused_kernel,
        out_shape=jax.ShapeDtypeStruct((N, C_out, HW), x.dtype),
        grid_spec=pltpu.PrefetchScalarGridSpec(
            num_scalar_prefetch=0,
            grid=(N,),
            in_specs=[
                pl.BlockSpec((None, C, HW), lambda n: (n, 0, 0)),  # x (batch slice)
                pl.BlockSpec((HW, B2), lambda n: (0, 0)),          # P_T_cat
                pl.BlockSpec((RB, C), lambda n: (0, 0)),           # W_cat (scale folded)
                pl.BlockSpec((RB, 1), lambda n: (0, 0)),           # bias_cat (column)
                pl.BlockSpec((RB, B2), lambda n: (0, 0)),          # mask_cat
                pl.BlockSpec((B2, HW), lambda n: (0, 0)),          # U_T_cat
            ],
            out_specs=pl.BlockSpec((None, C_out, HW), lambda n: (n, 0, 0)),
        ),
        compiler_params=pltpu.CompilerParams(
            dimension_semantics=("parallel",)),
    )(x_flat, fused["P_T_cat"], fused["W_cat"], fused["bias_cat"],
      fused["mask_cat"], fused["U_T_cat"])
    return out.reshape(N, C_out, H, W)


# ---------------------------------------------------------------------------
# Glue: linear operators for adaptive avg-pool / bilinear upsample + stacking.
# ---------------------------------------------------------------------------
def adaptive_pool_matrix(out_size, in_size):
    """A[i, h] so that pooled[i] = sum_h A[i,h] * x[h] matches AdaptiveAvgPool."""
    A = np.zeros((out_size, in_size), np.float32)
    for i in range(out_size):
        start = (i * in_size) // out_size
        end = -((-(i + 1) * in_size) // out_size)   # ceil((i+1)*in/out)
        A[i, start:end] = 1.0 / float(end - start)
    return A


def bilinear_upsample_matrix(out_size, in_size):
    """U[o, i] so that up[o] = sum_i U[o,i] * x[i] (align_corners=True)."""
    U = np.zeros((out_size, in_size), np.float32)
    for o in range(out_size):
        if in_size == 1 or out_size == 1:
            src = 0.0
        else:
            src = o * (in_size - 1) / (out_size - 1)
        i0 = min(int(np.floor(src)), in_size - 1)
        i1 = min(i0 + 1, in_size - 1)
        f = src - i0
        U[o, i0] += 1.0 - f
        U[o, i1] += f
    return U


def make_ppm_params(key, in_dim, red_dim, bins, H, W, eps=1e-5):
    """Returns (fused_params_dict, per_branch_params_list_for_reference)."""
    num_bins = len(bins)
    keys = jax.random.split(key, num_bins)
    branch = []
    for k, b in zip(keys, bins):
        k_w, k_g, k_b, k_m, k_v = jax.random.split(k, 5)
        conv_w = jax.random.normal(k_w, (red_dim, in_dim), jnp.float32) * 0.1
        gamma = 1.0 + 0.1 * jax.random.normal(k_g, (red_dim,), jnp.float32)
        beta = 0.1 * jax.random.normal(k_b, (red_dim,), jnp.float32)
        mean = 0.1 * jax.random.normal(k_m, (red_dim,), jnp.float32)
        var = 1.0 + 0.1 * jax.random.uniform(k_v, (red_dim,), jnp.float32)
        # Eval-mode BatchNorm folded into per-channel scale/bias.
        scale = gamma / jnp.sqrt(var + eps)
        bias = beta - mean * scale
        # Spatial operators (kron of 1-D operators acts on the flattened H*W grid).
        P = np.kron(adaptive_pool_matrix(b, H), adaptive_pool_matrix(b, W))  # (b*b, HW)
        Ufull = np.kron(bilinear_upsample_matrix(H, b),
                        bilinear_upsample_matrix(W, b))                      # (HW, b*b)
        branch.append(dict(W=conv_w, scale=scale, bias=bias,
                           P_T=jnp.asarray(P.T), U_T=jnp.asarray(Ufull.T)))

    # ---- fused (stacked over bins) parameters -----------------------------
    RB = num_bins * red_dim
    b2s = [b * b for b in bins]
    B2 = int(sum(b2s))
    # BN scale folded directly into the conv weights; branches stacked on rows.
    W_cat = jnp.concatenate([p["scale"][:, None] * p["W"] for p in branch], axis=0)
    P_T_cat = jnp.concatenate([p["P_T"] for p in branch], axis=1)   # (HW, B2)
    U_T_cat = jnp.concatenate([p["U_T"] for p in branch], axis=0)   # (B2, HW)
    bias_cat = np.zeros((RB, 1), np.float32)
    mask_cat = np.zeros((RB, B2), np.float32)
    col = 0
    for i, p in enumerate(branch):
        r0 = i * red_dim
        bias_cat[r0:r0 + red_dim, 0] = np.asarray(p["bias"])
        mask_cat[r0:r0 + red_dim, col:col + b2s[i]] = 1.0
        col += b2s[i]
    fused = dict(W_cat=W_cat, P_T_cat=P_T_cat, U_T_cat=U_T_cat,
                 bias_cat=jnp.asarray(bias_cat), mask_cat=jnp.asarray(mask_cat))
    return fused, branch


# ---------------------------------------------------------------------------
# Pure-JAX per-branch reference (original per-branch ordering) for correctness.
# ---------------------------------------------------------------------------
def ppm_forward_ref(x, branch):
    N, C, H, W = x.shape
    x_flat = x.reshape(N, C, H * W)
    outs = [x]
    for p in branch:
        pooled = jnp.einsum("nch,hb->ncb", x_flat, p["P_T"])
        y = jnp.einsum("oc,ncb->nob", p["W"], pooled)
        y = jnp.maximum(y * p["scale"][None, :, None] + p["bias"][None, :, None], 0.0)
        o = jnp.einsum("nob,bh->noh", y, p["U_T"])
        outs.append(o.reshape(N, -1, H, W))
    return jnp.concatenate(outs, axis=1)


if __name__ == "__main__":
    # Small shapes consistent with the module: in_dim=8, reduction_dim=2,
    # bins=(1, 2, 3, 6), input x: (2, 8, 16, 16) NCHW.
    N, C, H, W = 2, 8, 16, 16
    red_dim = 2
    bins = (1, 2, 3, 6)

    key = jax.random.PRNGKey(0)
    kx, kp = jax.random.split(key)
    x = jax.random.normal(kx, (N, C, H, W), jnp.float32)

    fused, branch = make_ppm_params(kp, C, red_dim, bins, H, W)

    out = jax.block_until_ready(ppm_forward(x, fused))
    ref = jax.block_until_ready(ppm_forward_ref(x, branch))

    assert out.shape == (N, C + len(bins) * red_dim, H, W)
    np.testing.assert_allclose(np.asarray(out), np.asarray(ref), rtol=1e-4, atol=1e-5)

    print("KERNEL_OK")
</pallas_src>

<mosaic_0001>
module attributes {stable_mosaic.version = 11 : i64} {
  func.func @ppm_fused_kernel(%arg0: i32, %arg1: memref<1x8x256xf32, #tpu.memory_space<vmem>>, %arg2: memref<256x50xf32, #tpu.memory_space<vmem>>, %arg3: memref<8x8xf32, #tpu.memory_space<vmem>>, %arg4: memref<8x1xf32, #tpu.memory_space<vmem>>, %arg5: memref<8x50xf32, #tpu.memory_space<vmem>>, %arg6: memref<50x256xf32, #tpu.memory_space<vmem>>, %arg7: memref<1x16x256xf32, #tpu.memory_space<vmem>>) attributes {dimension_semantics = [#tpu.dimension_semantics<parallel>], iteration_bounds = array<i64: 2>, scalar_prefetch = 0 : i64, scratch_operands = 0 : i64, tpu.core_type = #tpu.core_type<tc>, window_params = [{transform_indices = @transform_0, window_bounds = array<i64: 1, 8, 256>}, {pipeline_mode = #tpu.pipeline_mode<synchronous>, transform_indices = @transform_1, window_bounds = array<i64: 256, 50>}, {pipeline_mode = #tpu.pipeline_mode<synchronous>, transform_indices = @transform_2, window_bounds = array<i64: 8, 8>}, {pipeline_mode = #tpu.pipeline_mode<synchronous>, transform_indices = @transform_3, window_bounds = array<i64: 8, 1>}, {pipeline_mode = #tpu.pipeline_mode<synchronous>, transform_indices = @transform_4, window_bounds = array<i64: 8, 50>}, {pipeline_mode = #tpu.pipeline_mode<synchronous>, transform_indices = @transform_5, window_bounds = array<i64: 50, 256>}, {transform_indices = @transform_6, window_bounds = array<i64: 1, 16, 256>}]} {
    %c0 = arith.constant 0 : index
    %c0_0 = arith.constant 0 : index
    %c0_1 = arith.constant 0 : index
    %0 = vector.load %arg1[%c0, %c0_0, %c0_1] : memref<1x8x256xf32, #tpu.memory_space<vmem>>, vector<1x8x256xf32>
    %1 = vector.shape_cast %0 : vector<1x8x256xf32> to vector<8x256xf32>
    %c0_2 = arith.constant 0 : index
    %c0_3 = arith.constant 0 : index
    %2 = vector.load %arg2[%c0_2, %c0_3] : memref<256x50xf32, #tpu.memory_space<vmem>>, vector<256x50xf32>
    %cst = arith.constant dense<0.000000e+00> : vector<8x50xf32>
    %3 = tpu.matmul %1, %2, %cst {dimension_numbers = #tpu.dot_dimension_numbers<[1], [0], [0], [1], [0, 0, 1, 1], [], []>} : vector<8x256xf32>, vector<256x50xf32>, vector<8x50xf32> -> vector<8x50xf32>
    %c0_4 = arith.constant 0 : index
    %c0_5 = arith.constant 0 : index
    %4 = vector.load %arg3[%c0_4, %c0_5] : memref<8x8xf32, #tpu.memory_space<vmem>>, vector<8x8xf32>
    %cst_6 = arith.constant dense<0.000000e+00> : vector<8x50xf32>
    %5 = tpu.matmul %4, %3, %cst_6 {dimension_numbers = #tpu.dot_dimension_numbers<[1], [0], [0], [1], [0, 0, 1, 1], [], []>} : vector<8x8xf32>, vector<8x50xf32>, vector<8x50xf32> -> vector<8x50xf32>
    %c0_7 = arith.constant 0 : index
    %c0_8 = arith.constant 0 : index
    %6 = vector.load %arg4[%c0_7, %c0_8] : memref<8x1xf32, #tpu.memory_space<vmem>>, vector<8x1xf32>
    %7 = vector.broadcast %6 : vector<8x1xf32> to vector<8x50xf32>
    %8 = arith.addf %5, %7 : vector<8x50xf32>
    %cst_9 = arith.constant 0.000000e+00 : f32
    %9 = vector.broadcast %cst_9 : f32 to vector<8x50xf32>
    %10 = arith.maximumf %8, %9 : vector<8x50xf32>
    %c0_10 = arith.constant 0 : index
    %c0_11 = arith.constant 0 : index
    %11 = vector.load %arg5[%c0_10, %c0_11] : memref<8x50xf32, #tpu.memory_space<vmem>>, vector<8x50xf32>
    %12 = arith.mulf %10, %11 : vector<8x50xf32>
    %c0_12 = arith.constant 0 : index
    %c0_13 = arith.constant 0 : index
    %13 = vector.load %arg6[%c0_12, %c0_13] : memref<50x256xf32, #tpu.memory_space<vmem>>, vector<50x256xf32>
    %cst_14 = arith.constant dense<0.000000e+00> : vector<8x256xf32>
    %14 = tpu.matmul %12, %13, %cst_14 {dimension_numbers = #tpu.dot_dimension_numbers<[1], [0], [0], [1], [0, 0, 1, 1], [], []>} : vector<8x50xf32>, vector<50x256xf32>, vector<8x256xf32> -> vector<8x256xf32>
    %c0_15 = arith.constant 0 : index
    %c0_16 = arith.constant 0 : index
    %c0_17 = arith.constant 0 : index
    %15 = vector.load %arg7[%c0_15, %c0_16, %c0_17] : memref<1x16x256xf32, #tpu.memory_space<vmem>>, vector<1x8x256xf32>
    %16 = vector.shape_cast %15 : vector<1x8x256xf32> to vector<8x256xf32>
    %17 = vector.shape_cast %1 : vector<8x256xf32> to vector<1x8x256xf32>
    tpu.vector_store %arg7[%c0_15, %c0_16, %c0_17], %17 {strides = array<i32>} : memref<1x16x256xf32, #tpu.memory_space<vmem>>, vector<1x8x256xf32>,
    %c0_18 = arith.constant 0 : index
    %c8 = arith.constant 8 : index
    %c0_19 = arith.constant 0 : index
    %18 = vector.load %arg7[%c0_18, %c8, %c0_19] : memref<1x16x256xf32, #tpu.memory_space<vmem>>, vector<1x8x256xf32>
    %19 = vector.shape_cast %18 : vector<1x8x256xf32> to vector<8x256xf32>
    %20 = vector.shape_cast %14 : vector<8x256xf32> to vector<1x8x256xf32>
    tpu.vector_store %arg7[%c0_18, %c8, %c0_19], %20 {strides = array<i32>} : memref<1x16x256xf32, #tpu.memory_space<vmem>>, vector<1x8x256xf32>,
    return
  }
  func.func @transform_0(%arg0: i32) -> (i32, i32, i32) {
    %c0_i32 = arith.constant 0 : i32
    %c0_i32_0 = arith.constant 0 : i32
    %c0_i32_1 = arith.constant 0 : i32
    return %arg0, %c0_i32, %c0_i32_0 : i32, i32, i32
  }
  func.func @transform_1(%arg0: i32) -> (i32, i32) {
    %c0_i32 = arith.constant 0 : i32
    %c0_i32_0 = arith.constant 0 : i32
    %c0_i32_1 = arith.constant 0 : i32
    return %c0_i32, %c0_i32_0 : i32, i32
  }
  func.func @transform_2(%arg0: i32) -> (i32, i32) {
    %c0_i32 = arith.constant 0 : i32
    %c0_i32_0 = arith.constant 0 : i32
    %c0_i32_1 = arith.constant 0 : i32
    return %c0_i32, %c0_i32_0 : i32, i32
  }
  func.func @transform_3(%arg0: i32) -> (i32, i32) {
    %c0_i32 = arith.constant 0 : i32
    %c0_i32_0 = arith.constant 0 : i32
    %c0_i32_1 = arith.constant 0 : i32
    return %c0_i32, %c0_i32_0 : i32, i32
  }
  func.func @transform_4(%arg0: i32) -> (i32, i32) {
    %c0_i32 = arith.constant 0 : i32
    %c0_i32_0 = arith.constant 0 : i32
    %c0_i32_1 = arith.constant 0 : i32
    return %c0_i32, %c0_i32_0 : i32, i32
  }
  func.func @transform_5(%arg0: i32) -> (i32, i32) {
    %c0_i32 = arith.constant 0 : i32
    %c0_i32_0 = arith.constant 0 : i32
    %c0_i32_1 = arith.constant 0 : i32
    return %c0_i32, %c0_i32_0 : i32, i32
  }
  func.func @transform_6(%arg0: i32) -> (i32, i32, i32) {
    %c0_i32 = arith.constant 0 : i32
    %c0_i32_0 = arith.constant 0 : i32
    %c0_i32_1 = arith.constant 0 : i32
    return %arg0, %c0_i32, %c0_i32_0 : i32, i32, i32
  }
}

</mosaic_0001>

<bundles_post_ra>
// kernel: tpu_custom_call.1
= control target key start
LH: loop header
LB: loop body
LE: loop exit
PB: predicated region body
PF: predicated region fallthrough
CT: control target
= control target key end

     0   :  { %11 = vsyncpa [#allocation3], 0  ;;  %s1082_s0 = inlined_call_operand.vmem [shape: f32[2,8,256], index: 0, kind: input, shape index: {}]   ;;  %s1083_s1 = inlined_call_operand.vmem [shape: f32[256,50], index: 1, kind: input, shape index: {}]   ;;  %s1084_s2 = inlined_call_operand.vmem [shape: f32[8,8], index: 2, kind: input, shape index: {}]   ;;  %s1085_s3 = inlined_call_operand.vmem [shape: f32[8,1], index: 3, kind: input, shape index: {}]   ;;  %s1086_s4 = inlined_call_operand.vmem [shape: f32[8,50], index: 4, kind: input, shape index: {}]   ;;  %s1087_s5 = inlined_call_operand.vmem [shape: f32[50,256], index: 5, kind: input, shape index: {}]   ;;  %s1088_s6 = inlined_call_operand.hbm [shape: f32[2,16,256], index: 6, kind: output, shape index: {}]  }
   0x1   :  { %13 = vsyncpa [#allocation3 + $0x1], 0  ;;  %s822_s21 = smov 0   ;;  %s824_s22 = smov 0  }
   0x2   :  { %s826_s23 = smov 0   ;;  %s828_s24 = smov 0  }
   0x3 LB: > { %s843_s25 = sadd.s32 4294967295, %s779_s24   ;;  %s614_s26 = sadd.s32 4294967294, %s779_s24   ;;  %s779_s24 = sphi %s828_s24, %s1094_s24   ;;  %s775_s23 = sphi %s826_s23, %s1093_s23   ;;  %s771_s22 = sphi %s824_s22, %s1092_s22   ;;  %s767_s21 = sphi %s822_s21, %s1091_s21  }
   0x4   : > { %s847_s27 = sadd.s32 1, %s779_s24   ;;  %s157_s28 = sadd.s32 1, %s775_s23 }
   0x5   : > { %s154_s29 = ssub.s32 %s779_s24, %s847_s27  ;;  %p167_p0 = scmp.ne.s32.totalorder %s775_s23, %s771_s22 }
   0x6   : > { %p155_p1 = scmp.eq.s32.totalorder %s154_s29, 0  ;;  %p168_p2 = scmp.eq.s32.totalorder %s843_s25, 1 }
   0x7   : > { %p173_p3 = scmp.ne.s32.totalorder %s771_s22, %s767_s21  ;;  %p174_p4 = scmp.eq.s32.totalorder %s614_s26, 1 }
   0x8   : > { %s858_s30 = scalar_select %p155_p1, %s775_s23, %s157_s28  }
   0x9   : > { %p860_p5 = por %p168_p2, %p167_p0  ;;  %p864_p6 = por %p174_p4, %p173_p3 }
   0xa   : > { %p617_p7 = scmp.ge.s32.totalorder %s779_s24, 1  ;;  %p215_p8 = scmp.lt.s32.totalorder %s779_s24, 3 }
   0xc   : > { %p216_p9 = pnand %p617_p7, %p215_p8 }
   0xd   : > { %p245_p10 = scmp.lt.s32.totalorder (!%p216_p9), %s843_s25, 1  ;;  %s242_s9 = sand.u32 (!%p216_p9), 1, %s771_s22  }
   0xe   : > { %219 = sbr.rel (%p216_p9) target bundleno = 658 (0x292), region = 44  ;;  %s618_s17 = sshll.u32 (!%p216_p9), %s242_s9, 5 }
   0xf   : > { %s1042_s13 = scalar_lea.sflag (!%p216_p9), [#allocation3], %s242_s9 }
  0x13   : > { %v283_v0 = vld [vmem:[%s1083_s1 + $0xf8] sm:$0xff]  ;;  %v282_v2 = vld [vmem:[%s1083_s1 + $0xf0] sm:$0xff]  ;;  %v281_v4 = vld [vmem:[%s1083_s1 + $0xe8] sm:$0xff]  ;;  %s246_s26 = scalar_select %p245_p10, %s843_s25, 1  ;;  %v781_v34 = vmov 0.0   ;;  %vm782_vm0 = vmmov 0  }
  0x14   : > { %v267_v1 = vld [vmem:[%s1083_s1 + $0x78] sm:$0xff]  ;;  %632 = vmatprep.subr.mxu0 %v283_v0  ;;  %v266_v3 = vld [vmem:[%s1083_s1 + $0x70] sm:$0xff]  ;;  %v265_v5 = vld [vmem:[%s1083_s1 + $0x68] sm:$0xff]  ;;  %669 = vmatprep.subr.mxu1 %v781_v34  ;;  %v783_v36 = vmov 0   ;;  %vm361_vm1 = vcmask 64512   ;;  %vm456_vm2 = vcmask 1041408  }
  0x15   : > { %633 = vmatpush3.msra.mxu0 %v267_v1  ;;  %v280_v6 = vld [vmem:[%s1083_s1 + $0xe0] sm:$0xff]  ;;  %s630_s12 = sshll.u32 %s246_s26, 4  ;;  %v279_v8 = vld [vmem:[%s1083_s1 + $0xd8] sm:$0xff]  ;;  %v278_v10 = vld [vmem:[%s1083_s1 + $0xd0] sm:$0xff]  ;;  %671 = vmatprep.mubr.msk.f32.mxu1 %vm782_vm0, %v781_v34  ;;  %vm452_vm3 = vcmask 408576  }
  0x16   : > { %634 = vmatprep.subr.mxu0 %v282_v2  ;;  %v264_v7 = vld [vmem:[%s1083_s1 + $0x60] sm:$0xff]  ;;  %v263_v9 = vld [vmem:[%s1083_s1 + $0x58] sm:$0xff]  ;;  %s249_s20 = scalar_lea.vmem %s1082_s0, %s630_s12  ;;  %v262_v11 = vld [vmem:[%s1083_s1 + $0x50] sm:$0xff]  ;;  %s920_s12 = scalar_lea.vmem [#allocation2], %s618_s17  ;;  %718 = vset.pattern.permute.xlu0 %v783_v36 }
  0x17   : > { %635 = vmatpush3.msra.mxu0 %v266_v3  ;;  %v277_v12 = vld [vmem:[%s1083_s1 + $0xc8] sm:$0xff]  ;;  %v250_v15 = vld [vmem:[%s249_s20] sm:$0xff]  ;;  %v275_v18 = vld [vmem:[%s1083_s1 + $0xb8] sm:$0xff]  ;;  %s552_s26 = sshll.u32 %s920_s12, 4  ;;  %s631_s17 = sshll.u32 %s843_s25, 9  ;;  %s1031_s26 = int_to_ptr.vmem [resolvable:$true] %s552_s26 }
  0x18   : > { %636 = vmatprep.subr.mxu0 %v281_v4  ;;  %v251_v13 = vld [vmem:[%s249_s20 + $0x8] sm:$0xff]  ;;  %v276_v16 = vld [vmem:[%s1083_s1 + $0xc0] sm:$0xff]  ;;  %534 = vst [vmem:[%s920_s12] sm:$0xff] %v250_v15  ;;  %v259_v19 = vld [vmem:[%s1083_s1 + $0x38] sm:$0xff]  ;;  %s1036_s11 = scalar_lea.hbm %s1088_s6, %s631_s17  ;;  %s719_s14 = scalar_lea.vmem %s1031_s26, 512 }
  0x19   : > { %637 = vmatpush3.msra.mxu0 %v265_v5  ;;  %v261_v14 = vld [vmem:[%s1083_s1 + $0x48] sm:$0xff]  ;;  %348 = vmatprep.mubr.f32.mxu0 %v251_v13  ;;  %535 = vst [vmem:[%s920_s12 + $0x8] sm:$0xff] %v251_v13  ;;  %v260_v17 = vld [vmem:[%s1083_s1 + $0x40] sm:$0xff]  ;;  %v274_v20 = vld [vmem:[%s1083_s1 + $0xb0] sm:$0xff]  ;;  %p720_p11 = scmp.ne.s32.totalorder %s1031_s26, %s719_s14  ;;  %s784_s25 = smov [#allocation2]  }
  0x1a   : > { %638 = vmatprep.subr.mxu0 %v280_v6  ;;  %v258_v21 = vld [vmem:[%s1083_s1 + $0x30] sm:$0xff]  ;;  %v273_v22 = vld [vmem:[%s1083_s1 + $0xa8] sm:$0xff]  ;;  %v272_v24 = vld [vmem:[%s1083_s1 + $0xa0] sm:$0xff]  ;;  %s723_s15 = sshll.u32 %s784_s25, 4  ;;  %s724_s15 = int_to_ptr.vmem [resolvable:$false] %s723_s15 }
  0x1b   : > { %639 = vmatpush3.msra.mxu0 %v264_v7  ;;  %v257_v23 = vld [vmem:[%s1083_s1 + $0x28] sm:$0xff]  ;;  %v256_v25 = vld [vmem:[%s1083_s1 + $0x20] sm:$0xff]  ;;  %v271_v26 = vld [vmem:[%s1083_s1 + $0x98] sm:$0xff]  ;;  %p721_p12 = pnand %p720_p11, %p860_p5  ;;  %s725_s16 = scalar_lea.vmem %s724_s15, 1024 }
  0x1c   : > { %640 = vmatprep.subr.mxu0 %v279_v8  ;;  %v255_v27 = vld [vmem:[%s1083_s1 + $0x18] sm:$0xff]  ;;  %v270_v28 = vld [vmem:[%s1083_s1 + $0x90] sm:$0xff]  ;;  %v269_v30 = vld [vmem:[%s1083_s1 + $0x88] sm:$0xff]  ;;  %p726_p0 = scmp.lt.s32.totalorder %s1031_s26, %s724_s15  ;;  %p727_p1 = scmp.lt.s32.totalorder %s725_s16, %s719_s14 }
  0x1d   : > { %641 = vmatpush3.msra.mxu0 %v263_v9  ;;  %v254_v29 = vld [vmem:[%s1083_s1 + $0x10] sm:$0xff]  ;;  %v253_v31 = vld [vmem:[%s1083_s1 + $0x8] sm:$0xff]  ;;  %v268_v32 = vld [vmem:[%s1083_s1 + $0x80] sm:$0xff]  ;;  %p722_p13 = pneg %p721_p12 }
  0x1e   : > { %642 = vmatprep.subr.mxu0 %v278_v10  ;;  %v252_v33 = vld [vmem:[%s1083_s1] sm:$0xff]  ;;  %v451_v41 = vld [vmem:[%s1087_s5 + $0x68] sm:$0x3]  ;;  %v449_v43 = vld [vmem:[%s1087_s5 + $0x58] sm:$0xff]  ;;  %p728_p2 = por %p727_p1, %p726_p0 }
  0x1f   : > { %643 = vmatpush3.msra.mxu0 %v262_v11  ;;  %v355_v35 = vld [vmem:[%s1085_s3] sm:$0xff]  ;;  %v448_v44 = vld [vmem:[%s1087_s5 + $0x50] sm:$0xff]  ;;  %v447_v45 = vld [vmem:[%s1087_s5 + $0x48] sm:$0xff] }
  0x20   : > { %644 = vmatprep.subr.mxu0 %v277_v12  ;;  %358 = vperm.xlu0 %718, %v355_v35   ;;  %v354_v40 = vld [vmem:[%s1084_s2] sm:$0xff]  ;;  %v445_v47 = vld [vmem:[%s1087_s5 + $0x38] sm:$0xff]  ;;  %v444_v48 = vld [vmem:[%s1087_s5 + $0x30] sm:$0xff]  ;;  %p729_p3 = pnand %p728_p2, %p722_p13 }
  0x21   : > { %645 = vmatpush3.msra.mxu0 %v261_v14  ;;  %v450_v42 = vld [vmem:[%s1087_s5 + $0x60] sm:$0x3]  ;;  %v443_v49 = vld [vmem:[%s1087_s5 + $0x28] sm:$0xff]  ;;  %v441_v51 = vld [vmem:[%s1087_s5 + $0x18] sm:$0xff] }
  0x22   : > { %646 = vmatprep.subr.mxu0 %v276_v16  ;;  %v446_v46 = vld [vmem:[%s1087_s5 + $0x40] sm:$0xff]  ;;  %v440_v52 = vld [vmem:[%s1087_s5 + $0x10] sm:$0xff]  ;;  %v439_v53 = vld [vmem:[%s1087_s5 + $0x8] sm:$0xff] }
  0x23   : > { %647 = vmatpush3.msra.mxu0 %v260_v17  ;;  %v442_v50 = vld [vmem:[%s1087_s5 + $0x20] sm:$0xff] }
  0x24   : > { %648 = vmatprep.subr.mxu0 %v275_v18  ;;  %v438_v54 = vld [vmem:[%s1087_s5] sm:$0xff] }
  0x25   : > { %649 = vmatpush3.msra.mxu0 %v259_v19  ;;  %v436_v58 = vld [vmem:[%s1086_s4] sm:$0xff] }
  0x26   : > { %650 = vmatprep.subr.mxu0 %v274_v20 }
  0x27   : > { %651 = vmatpush3.msra.mxu0 %v258_v21 }
  0x28   : > { %652 = vmatprep.subr.mxu0 %v273_v22 }
  0x29   : > { %653 = vmatpush3.msra.mxu0 %v257_v23 }
  0x2a   : > { %654 = vmatprep.subr.mxu0 %v272_v24 }
  0x2b   : > { %655 = vmatpush3.msra.mxu0 %v256_v25 }
  0x2c   : > { %656 = vmatprep.subr.mxu0 %v271_v26 }
  0x2d   : > { %657 = vmatpush3.msra.mxu0 %v255_v27 }
  0x2e   : > { %658 = vmatprep.subr.mxu0 %v270_v28 }
  0x2f   : > { %659 = vmatpush3.msra.mxu0 %v254_v29 }
  0x30   : > { %660 = vmatprep.subr.mxu0 %v269_v30 }
  0x31   : > { %661 = vmatpush3.msra.mxu0 %v253_v31 }
  0x32   : > { %662 = vmatprep.subr.mxu0 %v268_v32 }
  0x33   : > { %663 = vmatpush3.msra.mxu0 %v252_v33 }
  0x34   : > { %349 = vmatmul.mubr.f32.vlgmr.msra.gmra.mxu0 %v250_v15 }
  0x9b   : > { %v359_v55 = vpop.permute.xlu0 %358 }
  0xf4   : > { %v664_v37 = vpop.f32.mrf.mxu0 }
  0xf6   : > { %v665_v38 = vpop.f32.mrf.mxu0 }
  0xf7   : > { %v666_v39 = vadd.f32 %v665_v38, %v664_v37 }
  0xf9   : > { %670 = vmatpush3.msra.mxu1 %v666_v39 }
  0xfa   : > { %672 = vmatmul.mubr.msk.f32.vlgmr.msra.gmra.mxu1 %vm361_vm1, %v354_v40  ;;  %622 = vmatprep.subr.msk.mxu1 %vm456_vm2, %v451_v41 }
  0xfb   : > { %623 = vmatpush1.msk.msra.mxu1 %vm456_vm2, %v450_v42  ;;  %527 = vmatprep.mubr.f32.mxu1 %v781_v34 }
  0xfc   : > { %483 = vmatprep.subr.mxu1 %v449_v43 }
  0xfd   : > { %484 = vmatpush1.msra.mxu1 %v448_v44 }
  0xfe   : > { %485 = vmatprep.subr.mxu1 %v447_v45 }
  0xff   : > { %486 = vmatpush1.msra.mxu1 %v446_v46 }
 0x100   : > { %487 = vmatprep.subr.mxu1 %v445_v47 }
 0x101   : > { %488 = vmatpush1.msra.mxu1 %v444_v48 }
 0x102   : > { %489 = vmatprep.subr.mxu1 %v443_v49 }
 0x103   : > { %490 = vmatpush1.msra.mxu1 %v442_v50 }
 0x104   : > { %491 = vmatprep.subr.mxu1 %v441_v51 }
 0x105   : > { %492 = vmatpush1.msra.mxu1 %v440_v52 }
 0x106   : > { %493 = vmatprep.subr.mxu1 %v439_v53 }
 0x107   : > { %494 = vmatpush1.msra.mxu1 %v438_v54 }
 0x1ba   : > { %v431_v56 = vpop.f32.mrf.mxu1 }
 0x1bb   : > { %v432_v57 = vadd.f32 %v431_v56, %v359_v55 }
 0x1bc   : > { %v673_v59 = vpop.f32.mrf.mxu1 }
 0x1bd   : > { %v435_v60 = vmax.f32 %v432_v57, 0.0 }
 0x1bf   : > { %v437_v61 = vmul.f32 %v436_v58, %v435_v60 }
 0x1c1   : > { %624 = vmatmul.mubr.msk.f32.vlgmr.msra.gmra.mxu1 %vm452_vm3, %v437_v61 }
 0x281   : > { %v529_v62 = vpop.f32.mrf.mxu1 }
 0x282   : > { %536 = vst [vmem:[%s920_s12 + $0x10] sm:$0xff] %v529_v62 }
 0x283   : > { %v531_v63 = vpop.f32.mrf.mxu1 }
 0x284   : > { %537 = vst [vmem:[%s920_s12 + $0x18] sm:$0xff] %v531_v63 }
 0x285   : > { %732 = shalt.err (!%p729_p3)
}
 0x286   : > { %s733_s9 = scalar_lea.hbm %s1036_s11, 512  ;;  %s737_s19 = scalar_lea.hbm %s1088_s6, 1024 }
 0x287   : > { %p734_p4 = scmp.ne.s32.totalorder %s1036_s11, %s733_s9  ;;  %p738_p9 = scmp.lt.s32.totalorder %s1036_s11, %s1088_s6 }
 0x288   : > { %p739_p10 = scmp.lt.s32.totalorder %s737_s19, %s733_s9 }
 0x289   : > { %p735_p7 = pnand %p734_p4, %p860_p5 }
 0x28a   : > { %p740_p11 = por %p739_p10, %p738_p9 }
 0x28b   : > { %p736_p8 = pneg %p735_p7 }
 0x28d   : > { %p741_p12 = pnand %p740_p11, %p736_p8 }
 0x28f   : > { %744 = shalt.err (!%p741_p12)
}
 0x290   : > { %s785_s17 = smov 256   ;;  %s786_s10 = smov 16  }
 0x291   : > { %674 = dma.vmem_to_hbm [thread:$0]  (%p860_p5), %s1031_s26, 512, %s1036_s11, %s1042_s13, %s785_s17, %s785_s17, %s786_s10  }
 0x292 PF: > { %p680_p13 = scmp.ge.s32.totalorder %s779_s24, 2  ;;  %s567_s20 = sand.u32 1, %s767_s21  }
 0x293   : > { %s568_s14 = scalar_lea.sflag [#allocation3], %s567_s20 }
 0x294   : > { %p677_p0 = pnand %p680_p13, %p864_p6 }
 0x296   : > { %p678_p1 = pneg %p677_p0 }
 0x298   : > { %762 = dma.done.wait (%p678_p1), %s568_s14, 512  }
 0x299   : > { %764 = vsyncadd (%p678_p1), %s568_s14, 4294966784  ;;  %p16_p2 = scmp.ge.s32.totalorder %s847_s27, 4   ;;  %s1091_s21 = smov %s771_s22 }
 0x29a   : > { %s1092_s22 = smov %s775_s23  ;;  %s1093_s23 = smov %s858_s30 }
 0x29b   : > { %s1094_s24 = smov %s847_s27  ;;  %18 = sbr.rel (!%p16_p2) target bundleno = 3 (0x3), region = 79 }
 0x2a0   :  { %573 = vsyncpa [#allocation3], 1 }
 0x2a1   :  { %575 = vsyncpa [#allocation3 + $0x1], 1 }

</bundles_post_ra>
